<compile_context>
chip_gen: v7x
topology: tpu7x:2x2x1
jax: 0.10.0
libtpu: 0.0.40
codegen_flags: <defaults>
</compile_context>

<pallas_src>
import jax
import jax.numpy as jnp
from jax.experimental import pallas as pl
from jax.experimental.pallas import tpu as pltpu


# ----------------------------------------------------------------------------
# Helpers
# ----------------------------------------------------------------------------
def _cdiv(a, b):
    return (a + b - 1) // b


def _round_up(x, m):
    return _cdiv(x, m) * m


def _sublane(dtype):
    # dtype-correct sublane tile: f32 -> 8, bf16 -> 16, int8/fp8 -> 32
    return {4: 8, 2: 16, 1: 32}.get(jnp.dtype(dtype).itemsize, 8)


def _vmem_capacity_bytes():
    try:
        cap = int(pltpu.get_tpu_info().vmem_capacity_bytes)
        if cap > 0:
            return cap
    except Exception:
        pass
    return 64 * 1024 * 1024  # conservative fallback = v7x per-TC VMEM


def _spec(shape, index_map, buffer_count=None):
    """BlockSpec helper: single-buffer grid-invariant operands when supported."""
    if buffer_count is not None and hasattr(pl, "Buffered"):
        try:
            return pl.BlockSpec(shape, index_map,
                                pipeline_mode=pl.Buffered(buffer_count))
        except TypeError:  # older jax without pipeline_mode kwarg
            pass
    return pl.BlockSpec(shape, index_map)


def _choose_tiles(M, N, *, sublane, vmem_cap, max_tile_m,
                  resident_fixed, bytes_per_out_col, bytes_per_row_fixed,
                  out_itemsize):
    """Pick (tile_m, tile_n) against ~80% of this generation's VMEM."""
    budget = int(0.80 * vmem_cap)

    # 1) tile_n: keep the N-side weights resident (single-buffered) if they fit
    #    in half the budget; otherwise stream 128-lane-multiple column slices.
    tile_n = N
    while True:
        nbuf = 1 if tile_n >= N else 2
        resident = resident_fixed + nbuf * tile_n * bytes_per_out_col
        if resident <= budget // 2 or tile_n <= 128:
            break
        tile_n = max(128, _round_up(tile_n // 2, 128))
    num_n = _cdiv(N, tile_n)

    # 2) tile_m: balanced over M (avoid a near-empty last tile), >=2 grid steps
    #    when M allows (v7x has 2 TensorCores), sublane-aligned, and capped by
    #    whatever VMEM remains after the resident weights.
    num_m = _cdiv(M, max_tile_m)
    if num_m < 2 and M >= 2 * sublane:
        num_m = 2
    tile_m = _round_up(_cdiv(M, num_m), sublane)
    per_row = bytes_per_row_fixed + 2 * tile_n * out_itemsize + 4 * tile_n
    avail = max(budget - resident, 0)
    rows_cap = max(sublane, (avail // max(per_row, 1)) // sublane * sublane)
    tile_m = int(max(sublane, min(tile_m, rows_cap)))
    num_m = _cdiv(M, tile_m)

    need = resident + tile_m * per_row
    return int(tile_m), int(num_m), int(tile_n), int(num_n), int(need)


# ----------------------------------------------------------------------------
# Kernels
# ----------------------------------------------------------------------------
def _fused_two_linear_kernel(x_ref, w1_ref, w2_ref, b_ref, o_ref):
    # original_layer: h = x @ W1          (b1 folded into b in the wrapper)
    h = jnp.dot(x_ref[...].astype(w1_ref.dtype), w1_ref[...],
                preferred_element_type=jnp.float32)
    # shared_layer:   y = h @ W2 + (b1 @ W2 + b2)   -- f32 epilogue
    y = jnp.dot(h.astype(w2_ref.dtype), w2_ref[...],
                preferred_element_type=jnp.float32)
    o_ref[...] = (y + b_ref[...]).astype(o_ref.dtype)


def _single_linear_kernel(x_ref, w_ref, b_ref, o_ref):
    # Collapsed path: y = x @ (W1 @ W2) + (b1 @ W2 + b2)
    y = jnp.dot(x_ref[...].astype(w_ref.dtype), w_ref[...],
                preferred_element_type=jnp.float32)
    o_ref[...] = (y + b_ref[...]).astype(o_ref.dtype)


# ----------------------------------------------------------------------------
# Wrapper
# ----------------------------------------------------------------------------
def custom_original_layer(x, w1, b1, w2, b2, *, max_tile_m=512,
                          compute_dtype=None, collapse="auto"):
    """Pallas TPU forward of CustomOriginalLayer(Linear(K,H), Linear(H,N)):
        y = shared_layer(original_layer(x)) = (x @ W1 + b1) @ W2 + b2

    x  : [M, K]   (tokens on sublanes, features on lanes)
    w1 : [K, H]   transposed nn.Linear weight of original_layer
    b1 : [1, H]
    w2 : [H, N]   transposed nn.Linear weight of shared_layer
    b2 : [1, N]
    returns [M, N]
    """
    M, K = x.shape
    K2, H = w1.shape
    H2, N = w2.shape
    assert K2 == K and H2 == H and b1.shape == (1, H) and b2.shape == (1, N)

    out_dtype = x.dtype
    sublane = max(_sublane(x.dtype), _sublane(out_dtype))
    vmem_cap = _vmem_capacity_bytes()
    x_itm = x.dtype.itemsize
    out_itm = jnp.dtype(out_dtype).itemsize

    # Fold b1 into the output bias once (one tiny XLA op on params):
    #   (x@W1 + b1)@W2 + b2 == (x@W1)@W2 + (b1@W2 + b2)
    b_fused = (b1.astype(jnp.float32) @ w2.astype(jnp.float32)
               + b2.astype(jnp.float32))                       # (1, N) f32

    if collapse == "auto":
        # Collapsing to one matmul is cheaper when K*N <= K*H + H*N.
        collapse = (K * N) <= (K * H + H * N)

    if collapse:
        w_eff = w1.astype(jnp.float32) @ w2.astype(jnp.float32)   # [K, N]
        if compute_dtype is not None:
            w_eff = w_eff.astype(compute_dtype)
        w_itm = w_eff.dtype.itemsize
        tile_m, num_m, tile_n, num_n, need = _choose_tiles(
            M, N, sublane=sublane, vmem_cap=vmem_cap, max_tile_m=max_tile_m,
            resident_fixed=0,
            bytes_per_out_col=K * w_itm + 4,
            bytes_per_row_fixed=2 * K * x_itm,
            out_itemsize=out_itm)
        res_buf = 1 if num_n == 1 else None
        in_specs = [
            pl.BlockSpec((tile_m, K), lambda i, j: (i, 0)),           # x streamed
            _spec((K, tile_n), lambda i, j: (0, j), buffer_count=res_buf),  # W
            _spec((1, tile_n), lambda i, j: (0, j), buffer_count=res_buf),  # bias
        ]
        kernel = _single_linear_kernel
        operands = (x, w_eff, b_fused)
        flops = 2 * M * K * N
        bytes_accessed = (x.size * x_itm + w_eff.size * w_itm
                          + b_fused.size * 4 + M * N * out_itm)
    else:
        w1c = w1 if compute_dtype is None else w1.astype(compute_dtype)
        w2c = w2 if compute_dtype is None else w2.astype(compute_dtype)
        w1_itm, w2_itm = w1c.dtype.itemsize, w2c.dtype.itemsize
        tile_m, num_m, tile_n, num_n, need = _choose_tiles(
            M, N, sublane=sublane, vmem_cap=vmem_cap, max_tile_m=max_tile_m,
            resident_fixed=K * H * w1_itm,
            bytes_per_out_col=H * w2_itm + 4,
            bytes_per_row_fixed=2 * K * x_itm + 4 * H,   # + f32 intermediate h
            out_itemsize=out_itm)
        res_buf = 1 if num_n == 1 else None
        in_specs = [
            pl.BlockSpec((tile_m, K), lambda i, j: (i, 0)),            # x streamed
            _spec((K, H), lambda i, j: (0, 0), buffer_count=1),        # W1 resident
            _spec((H, tile_n), lambda i, j: (0, j), buffer_count=res_buf),  # W2
            _spec((1, tile_n), lambda i, j: (0, j), buffer_count=res_buf),  # bias
        ]
        kernel = _fused_two_linear_kernel
        operands = (x, w1c, w2c, b_fused)
        flops = 2 * M * (K * H * num_n + H * N)
        bytes_accessed = (x.size * x_itm + w1c.size * w1_itm + w2c.size * w2_itm
                          + b_fused.size * 4 + M * N * out_itm)

    out_spec = pl.BlockSpec((tile_m, tile_n), lambda i, j: (i, j))
    vmem_limit = int(min(0.90 * vmem_cap, max(1.5 * need, 16 * 1024 * 1024)))

    # Note: when N is not a multiple of 128 the output store is masked; padding
    # it away would cost extra HBM passes, which is worse in this regime.
    return pl.pallas_call(
        kernel,
        out_shape=jax.ShapeDtypeStruct((M, N), out_dtype),
        grid=(num_m, num_n),
        in_specs=in_specs,
        out_specs=out_spec,
        compiler_params=pltpu.CompilerParams(
            dimension_semantics=("parallel", "parallel"),
            vmem_limit_bytes=vmem_limit),
        cost_estimate=pl.CostEstimate(
            flops=int(flops), transcendentals=0,
            bytes_accessed=int(bytes_accessed)),
    )(*operands)


# ----------------------------------------------------------------------------
# Demo / self-test
# ----------------------------------------------------------------------------
if __name__ == "__main__":
    # Small shapes consistent with the module's forward:
    # batch=2, seq=8 -> M=16 tokens, K=32 in-features, H=64 intermediate,
    # N=32 out-features.
    batch, seq, K, H, N = 2, 8, 32, 64, 32
    M = batch * seq

    key = jax.random.PRNGKey(0)
    kx, kw1, kb1, kw2, kb2 = jax.random.split(key, 5)

    x = jax.random.normal(kx, (M, K), dtype=jnp.float32)
    # nn.Linear-shaped params, stored transposed as [in, out].
    w1 = jax.random.normal(kw1, (K, H), dtype=jnp.float32) * 0.05
    b1 = jax.random.normal(kb1, (1, H), dtype=jnp.float32) * 0.01
    w2 = jax.random.normal(kw2, (H, N), dtype=jnp.float32) * 0.05
    b2 = jax.random.normal(kb2, (1, N), dtype=jnp.float32) * 0.01

    # Pure-JAX reference of shared_layer(original_layer(x)).
    ref = (x @ w1 + b1) @ w2 + b2

    # 1) General fused two-matmul path (the CustomOriginalLayer composition).
    out_fused = jax.block_until_ready(
        custom_original_layer(x, w1, b1, w2, b2, collapse=False))
    # 2) Auto path: at these adapter sizes K*N <= K*H + H*N, so the wrapper
    #    algebraically collapses to a single-matmul kernel.
    out_auto = jax.block_until_ready(
        custom_original_layer(x, w1, b1, w2, b2))

    assert out_fused.shape == (M, N) and out_auto.shape == (M, N)
    assert jnp.allclose(out_fused, ref, atol=1e-4, rtol=1e-4)
    assert jnp.allclose(out_auto, ref, atol=1e-4, rtol=1e-4)

    print("KERNEL_OK")
</pallas_src>

<mosaic_0001>
module attributes {stable_mosaic.version = 11 : i64} {
  func.func @_fused_two_linear_kernel(%arg0: i32, %arg1: i32, %arg2: memref<8x32xf32, #tpu.memory_space<vmem>>, %arg3: memref<32x64xf32, #tpu.memory_space<vmem>>, %arg4: memref<64x32xf32, #tpu.memory_space<vmem>>, %arg5: memref<1x32xf32, #tpu.memory_space<vmem>>, %arg6: memref<8x32xf32, #tpu.memory_space<vmem>>) attributes {dimension_semantics = [#tpu.dimension_semantics<parallel>, #tpu.dimension_semantics<parallel>], iteration_bounds = array<i64: 2, 1>, scalar_prefetch = 0 : i64, scratch_operands = 0 : i64, tpu.core_type = #tpu.core_type<tc>, window_params = [{transform_indices = @transform_0, window_bounds = array<i64: 8, 32>}, {pipeline_mode = #tpu.pipeline_mode<synchronous>, transform_indices = @transform_1, window_bounds = array<i64: 32, 64>}, {pipeline_mode = #tpu.pipeline_mode<synchronous>, transform_indices = @transform_2, window_bounds = array<i64: 64, 32>}, {pipeline_mode = #tpu.pipeline_mode<synchronous>, transform_indices = @transform_3, window_bounds = array<i64: 1, 32>}, {transform_indices = @transform_4, window_bounds = array<i64: 8, 32>}]} {
    %c0 = arith.constant 0 : index
    %c0_0 = arith.constant 0 : index
    %0 = vector.load %arg2[%c0, %c0_0] : memref<8x32xf32, #tpu.memory_space<vmem>>, vector<8x32xf32>
    %c0_1 = arith.constant 0 : index
    %c0_2 = arith.constant 0 : index
    %1 = vector.load %arg3[%c0_1, %c0_2] : memref<32x64xf32, #tpu.memory_space<vmem>>, vector<32x64xf32>
    %cst = arith.constant dense<0.000000e+00> : vector<8x64xf32>
    %2 = tpu.matmul %0, %1, %cst {dimension_numbers = #tpu.dot_dimension_numbers<[1], [0], [0], [1], [0, 0, 1, 1], [], []>} : vector<8x32xf32>, vector<32x64xf32>, vector<8x64xf32> -> vector<8x64xf32>
    %c0_3 = arith.constant 0 : index
    %c0_4 = arith.constant 0 : index
    %3 = vector.load %arg4[%c0_3, %c0_4] : memref<64x32xf32, #tpu.memory_space<vmem>>, vector<64x32xf32>
    %cst_5 = arith.constant dense<0.000000e+00> : vector<8x32xf32>
    %4 = tpu.matmul %2, %3, %cst_5 {dimension_numbers = #tpu.dot_dimension_numbers<[1], [0], [0], [1], [0, 0, 1, 1], [], []>} : vector<8x64xf32>, vector<64x32xf32>, vector<8x32xf32> -> vector<8x32xf32>
    %c0_6 = arith.constant 0 : index
    %c0_7 = arith.constant 0 : index
    %5 = vector.load %arg5[%c0_6, %c0_7] : memref<1x32xf32, #tpu.memory_space<vmem>>, vector<1x32xf32>
    %6 = vector.broadcast %5 : vector<1x32xf32> to vector<8x32xf32>
    %7 = arith.addf %4, %6 : vector<8x32xf32>
    %c0_8 = arith.constant 0 : index
    %c0_9 = arith.constant 0 : index
    %8 = vector.load %arg6[%c0_8, %c0_9] : memref<8x32xf32, #tpu.memory_space<vmem>>, vector<8x32xf32>
    tpu.vector_store %arg6[%c0_8, %c0_9], %7 {strides = array<i32>} : memref<8x32xf32, #tpu.memory_space<vmem>>, vector<8x32xf32>,
    return
  }
  func.func @transform_0(%arg0: i32, %arg1: i32) -> (i32, i32) {
    %c0_i32 = arith.constant 0 : i32
    %c0_i32_0 = arith.constant 0 : i32
    return %arg0, %c0_i32 : i32, i32
  }
  func.func @transform_1(%arg0: i32, %arg1: i32) -> (i32, i32) {
    %c0_i32 = arith.constant 0 : i32
    %c0_i32_0 = arith.constant 0 : i32
    %c0_i32_1 = arith.constant 0 : i32
    return %c0_i32, %c0_i32_0 : i32, i32
  }
  func.func @transform_2(%arg0: i32, %arg1: i32) -> (i32, i32) {
    %c0_i32 = arith.constant 0 : i32
    %c0_i32_0 = arith.constant 0 : i32
    return %c0_i32, %arg1 : i32, i32
  }
  func.func @transform_3(%arg0: i32, %arg1: i32) -> (i32, i32) {
    %c0_i32 = arith.constant 0 : i32
    %c0_i32_0 = arith.constant 0 : i32
    return %c0_i32, %arg1 : i32, i32
  }
  func.func @transform_4(%arg0: i32, %arg1: i32) -> (i32, i32) {
    %c0_i32 = arith.constant 0 : i32
    return %arg0, %arg1 : i32, i32
  }
}

</mosaic_0001>

<bundles_post_ra>
// kernel: tpu_custom_call.1
= control target key start
LH: loop header
LB: loop body
LE: loop exit
PB: predicated region body
PF: predicated region fallthrough
CT: control target
= control target key end

     0   :  { %9 = vsyncpa [#allocation3], 0  ;;  %s915_s0 = inlined_call_operand.vmem [shape: f32[16,32], index: 0, kind: input, shape index: {}]   ;;  %s916_s1 = inlined_call_operand.vmem [shape: f32[32,64], index: 1, kind: input, shape index: {}]   ;;  %s917_s2 = inlined_call_operand.vmem [shape: f32[64,32], index: 2, kind: input, shape index: {}]   ;;  %s918_s3 = inlined_call_operand.vmem [shape: f32[1,32], index: 3, kind: input, shape index: {}]   ;;  %s919_s4 = inlined_call_operand.hbm [shape: f32[16,32], index: 4, kind: output, shape index: {}]  }
   0x1   :  { %11 = vsyncpa [#allocation3 + $0x1], 0  ;;  %s762_s15 = smov 0   ;;  %s764_s16 = smov 0  }
   0x2   :  { %s766_s17 = smov 0   ;;  %s768_s18 = smov 0  }
   0x3   :  { %s770_s19 = smov 0   ;;  %s772_s20 = smov 0  }
   0x4 LB: > { %s517_s21 = sadd.s32 4294967295, %s731_s20   ;;  %s518_s22 = sadd.s32 4294967294, %s731_s20   ;;  %s731_s20 = sphi %s772_s20, %s17_s20   ;;  %s727_s19 = sphi %s770_s19, %s926_s19   ;;  %s723_s18 = sphi %s768_s18, %s925_s18   ;;  %s719_s17 = sphi %s766_s17, %s924_s17   ;;  %s715_s16 = sphi %s764_s16, %s923_s16   ;;  %s711_s15 = sphi %s762_s15, %s922_s15  }
   0x5   : > { %s29_s23 = sadd.s32 1, %s727_s19  ;;  %s137_s24 = sadd.s32 1, %s719_s17 }
   0x6   : > { %p31_p0 = scmp.ge.s32.totalorder %s29_s23, 2  ;;  %p147_p1 = scmp.ne.s32.totalorder %s719_s17, %s715_s16 }
   0x7   : > { %p148_p2 = scmp.eq.s32.totalorder %s517_s21, 1  ;;  %p153_p3 = scmp.ne.s32.totalorder %s715_s16, %s711_s15 }
   0x8   : > { %s928_s23 = smov (%p31_p0, %s29_s23), 0  ;;  %p154_p5 = scmp.eq.s32.totalorder %s518_s22, 1 }
   0x9   : > { %p802_p4 = por %p148_p2, %p147_p1  ;;  %s132_s26 = ssub.s32 %s727_s19, %s928_s23 }
   0xa   : > { %p523_p6 = scmp.ge.s32.totalorder %s731_s20, 1  ;;  %p135_p7 = scmp.eq.s32.totalorder %s132_s26, 0 }
   0xb   : > { %p809_p8 = por %p154_p5, %p153_p3  ;;  %p195_p9 = scmp.lt.s32.totalorder %s731_s20, 3 }
   0xc   : > { %s815_s28 = scalar_select %p135_p7, %s719_s17, %s137_s24  }
   0xd   : > { %p196_p10 = pnand %p523_p6, %p195_p9 }
   0xe   : > { %v239_v0 = vld [vmem:[%s916_s1] sm:$0xff] (!%p196_p10)  ;;  %v240_v1 = vld [vmem:[%s916_s1 + $0x8] sm:$0xff] (!%p196_p10)  ;;  %v241_v2 = vld [vmem:[%s916_s1 + $0x10] sm:$0xff] (!%p196_p10)  ;;  %v733_v3 = vmov (!%p196_p10), 0.0|0.0   ;;  %vm734_vm0 = vmmov (!%p196_p10), 0   ;;  %v735_v6 = vmov (!%p196_p10), 0.0  }
   0xf   : > { %199 = sbr.rel (%p196_p10) target bundleno = 467 (0x1d3), region = 36  ;;  %577 = vmatprep.subr.bf16.mxu0 (!%p196_p10), %v733_v3  ;;  %v578_v4 = vpack.c.bf16 (!%p196_p10), %v240_v1, %v239_v0  ;;  %v242_v5 = vld [vmem:[%s916_s1 + $0x18] sm:$0xff] (!%p196_p10)  ;;  %555 = vmatprep.mubr.msk.f32.mxu0 (!%p196_p10), %vm734_vm0, %v735_v6  ;;  %p227_p11 = scmp.lt.s32.totalorder (!%p196_p10), %s723_s18, 1  ;;  %v317_v7 = vld [vmem:[%s917_s2] sm:$0xff] (!%p196_p10)  ;;  %v318_v8 = vld [vmem:[%s917_s2 + $0x8] sm:$0xff] (!%p196_p10)  ;;  %vm243_vm1 = vcmask (!%p196_p10), 261120  }
  0x10   : > { %583 = vmatprep.subr.bf16.mxu1 (!%p196_p10), %v733_v3  ;;  %v584_v9 = vpack.c.bf16 (!%p196_p10), %v318_v8, %v317_v7  ;;  %v319_v10 = vld [vmem:[%s917_s2 + $0x10] sm:$0xff] (!%p196_p10)  ;;  %v320_v11 = vld [vmem:[%s917_s2 + $0x18] sm:$0xff] (!%p196_p10)  ;;  %574 = vmatprep.mubr.msk.f32.mxu1 (!%p196_p10), %vm734_vm0, %v735_v6  ;;  %v581_v12 = vpack.c.bf16 (!%p196_p10), %v242_v5, %v241_v2  ;;  %v321_v14 = vld [vmem:[%s917_s2 + $0x20] sm:$0xff] (!%p196_p10)  ;;  %vm332_vm2 = vcmask (!%p196_p10), 523264   ;;  %s224_s22 = sand.u32 (!%p196_p10), 1, %s715_s16  }
  0x11   : > { %579 = vmatpush3.bf16.msra.mxu0 (!%p196_p10), %v578_v4  ;;  %v587_v13 = vpack.c.bf16 (!%p196_p10), %v320_v11, %v319_v10  ;;  %v322_v15 = vld [vmem:[%s917_s2 + $0x28] sm:$0xff] (!%p196_p10)  ;;  %v323_v18 = vld [vmem:[%s917_s2 + $0x30] sm:$0xff] (!%p196_p10)  ;;  %v324_v19 = vld [vmem:[%s917_s2 + $0x38] sm:$0xff] (!%p196_p10)  ;;  %s524_s24 = sshll.u32 (!%p196_p10), %s224_s22, 3  ;;  %s408_s10 = scalar_lea.sflag (!%p196_p10), [#allocation3], %s224_s22 }
  0x12   : > { %580 = vmatprep.subr.bf16.mxu0 (!%p196_p10), %v733_v3  ;;  %585 = vmatpush3.bf16.msra.mxu1 (!%p196_p10), %v584_v9  ;;  %v590_v17 = vpack.c.bf16 (!%p196_p10), %v322_v15, %v321_v14  ;;  %v593_v20 = vpack.c.bf16 (!%p196_p10), %v324_v19, %v323_v18  ;;  %v527_v23 = vld [vmem:[%s918_s3] ss:$0 sm:$0xff] (!%p196_p10)  ;;  %s226_s5 = scalar_lea.vmem (!%p196_p10), [#allocation2], %s524_s24 }
  0x13   : > { %586 = vmatprep.subr.bf16.mxu1 (!%p196_p10), %v733_v3  ;;  %s422_s6 = sshll.u32 (!%p196_p10), %s226_s5, 4  ;;  %s869_s6 = int_to_ptr.vmem [resolvable:$true] %s422_s6 }
  0x15   : > { %582 = vmatpush3.bf16.msra.mxu0 (!%p196_p10), %v581_v12 }
  0x16   : > { %s228_s29 = scalar_select %p227_p11, %s723_s18, 1  ;;  %588 = vmatpush3.bf16.msra.mxu1 %v587_v13 }
  0x17   : > { %589 = vmatprep.subr.bf16.mxu1 %v733_v3 }
  0x18   : > { %s525_s30 = sshll.u32 %s228_s29, 3 }
  0x19   : > { %s230_s11 = scalar_lea.vmem %s915_s0, %s525_s30  ;;  %s530_s30 = sshll.u32 %s723_s18, 7 }
  0x1a   : > { %v238_v16 = vld [vmem:[%s230_s11] sm:$0xff]  ;;  %591 = vmatpush3.bf16.msra.mxu1 %v590_v17  ;;  %s867_s9 = scalar_lea.hbm %s919_s4, %s530_s30  ;;  %s653_s11 = scalar_lea.vmem %s869_s6, 128 }
  0x1b   : > { %556 = vmatmul.mubr.msk.f32.vlgmr.msra.gmra.mrb[0].mxu0 %vm243_vm1, %v238_v16  ;;  %592 = vmatprep.subr.bf16.mxu1 %v733_v3  ;;  %p654_p12 = scmp.ne.s32.totalorder %s869_s6, %s653_s11  ;;  %s736_s18 = smov [#allocation2]  }
  0x1c   : > { %s657_s12 = sshll.u32 %s736_s18, 4  ;;  %s658_s12 = int_to_ptr.vmem [resolvable:$false] %s657_s12 }
  0x1d   : > { %p655_p13 = pnand %p654_p12, %p802_p4  ;;  %s659_s13 = scalar_lea.vmem %s658_s12, 256 }
  0x1e   : > { %594 = vmatpush3.bf16.msra.mxu1 %v593_v20  ;;  %p660_p1 = scmp.lt.s32.totalorder %s869_s6, %s658_s12  ;;  %p661_p2 = scmp.lt.s32.totalorder %s659_s13, %s653_s11 }
  0x1f   : > { %p656_p0 = pneg %p655_p13 }
  0x20   : > { %p662_p3 = por %p661_p2, %p660_p1 }
  0x22   : > { %p663_p5 = pnand %p662_p3, %p656_p0 }
  0xee   : > { %v313_v21 = vpop.f32.mrb[0].mxu0 }
  0xef   : > { %v557_v22 = vpop.f32.mrb[1].mxu0  ;;  %575 = vmatmul.mubr.msk.f32.vlgmr.msra.gmra.mrb[0].mxu1 %vm332_vm2, %v313_v21 }
 0x1c2   : > { %v402_v24 = vpop.f32.mrb[0].mxu1 }
 0x1c3   : > { %v403_v25 = vadd.f32 %v527_v23, %v402_v24  ;;  %v576_v26 = vpop.f32.mrb[1].mxu1 }
 0x1c5   : > { %406 = vst.msk [vmem:[%s226_s5] sm:$0xff] %vm243_vm1, %v403_v25 }
 0x1c6   : > { %666 = shalt.err (!%p663_p5)
}
 0x1c7   : > { %s667_s14 = scalar_lea.hbm %s867_s9, 128  ;;  %s671_s24 = scalar_lea.hbm %s919_s4, 256 }
 0x1c8   : > { %p668_p6 = scmp.ne.s32.totalorder %s867_s9, %s667_s14  ;;  %p672_p10 = scmp.lt.u32.totalorder %s867_s9, %s919_s4 }
 0x1c9   : > { %p673_p11 = scmp.lt.u32.totalorder %s671_s24, %s667_s14  ;;  %p675_p13 = scmp.lt.u32.totalorder %s667_s14, %s867_s9 }
 0x1ca   : > { %p669_p7 = pnand %p668_p6, %p802_p4 }
 0x1cb   : > { %p674_p12 = por %p673_p11, %p672_p10 }
 0x1cc   : > { %p670_p9 = pneg %p669_p7 }
 0x1cd   : > { %p676_p0 = por %p675_p13, %p674_p12 }
 0x1cf   : > { %p677_p1 = pnand %p676_p0, %p670_p9 }
 0x1d1   : > { %680 = shalt.err (!%p677_p1)
}
 0x1d2   : > { %595 = dma.vmem_to_hbm [thread:$0]  (%p802_p4), %s869_s6, 128, %s867_s9, %s408_s10  }
 0x1d3 PF: > { %p601_p2 = scmp.ge.s32.totalorder %s731_s20, 2  ;;  %s434_s30 = sand.u32 1, %s711_s15  }
 0x1d4   : > { %s435_s5 = scalar_lea.sflag [#allocation3], %s434_s30 }
 0x1d5   : > { %p598_p3 = pnand %p601_p2, %p809_p8 }
 0x1d7   : > { %706 = dma.done.wait (!%p598_p3), %s435_s5, 128  }
 0x1d8   : > { %708 = vsyncadd (!%p598_p3), %s435_s5, 4294967168  ;;  %s17_s20 = sadd.s32 1, %s731_s20   ;;  %s922_s15 = smov %s715_s16 }
 0x1d9   : > { %p14_p5 = scmp.ge.s32.totalorder %s17_s20, 4   ;;  %s923_s16 = smov %s719_s17 }
 0x1da   : > { %s924_s17 = smov %s815_s28  ;;  %s925_s18 = smov %s727_s19 }
 0x1db   : > { %s926_s19 = smov %s928_s23  ;;  %16 = sbr.rel (!%p14_p5) target bundleno = 4 (0x4), region = 77 }
 0x1e2   :  { %440 = vsyncpa [#allocation3], 1 }
 0x1e3   :  { %442 = vsyncpa [#allocation3 + $0x1], 1 }

</bundles_post_ra>
